<compile_context>
chip_gen: v5e
topology: v5e:2x2
jax: 0.10.0
libtpu: 0.0.40
codegen_flags: <defaults>
</compile_context>

<pallas_src>
import math
from functools import partial

import jax
import jax.numpy as jnp
from jax.experimental import pallas as pl
from jax.experimental.pallas import tpu as pltpu


def _mha_kernel(q_ref, qpos_ref, k_ref, kpos_ref, v_ref, id_ref,
                w_in_ref, b_in_ref, wo_ref, bo_ref, o_ref,
                *, num_heads, head_dim, batch, q_len, kv_len):
    H, d, B, L, S = num_heads, head_dim, batch, q_len, kv_len
    E = H * d

    # positional-encoding adds, fused in-kernel (rows already batch-flattened)
    x_q = q_ref[...] + qpos_ref[...]          # [B*L, E]
    x_k = k_ref[...] + kpos_ref[...]          # [B*S, E]
    x_v = v_ref[...]                          # [B*S, E]

    # One dense E-wide matmul per in-projection (q scale folded into w_in[0]/b_in[0]).
    qp = jnp.dot(x_q, w_in_ref[0], preferred_element_type=jnp.float32) + b_in_ref[0]
    kp = jnp.dot(x_k, w_in_ref[1], preferred_element_type=jnp.float32) + b_in_ref[1]
    vp = jnp.dot(x_v, w_in_ref[2], preferred_element_type=jnp.float32) + b_in_ref[2]

    # Head + batch view: [B*T, E] -> [H*B, T, d].
    # Only 2-D transposes, minor-dim swaps and sublane/leading regrouping
    # reshapes (the lane dim is never split).
    def to_heads(x, T):
        xt = x.T.reshape(H, d, B * T)          # [E, B*T] -> [H, d, B*T]
        xt = jnp.transpose(xt, (0, 2, 1))      # [H, B*T, d]
        return xt.reshape(H * B, T, d)         # [H*B, T, d]

    qh = to_heads(qp, L)                       # [H*B, L, d]
    kh = to_heads(kp, S)                       # [H*B, S, d]
    vh = to_heads(vp, S)                       # [H*B, S, d]

    # Attention with a single fused (h, b) batch dim.
    s = jnp.einsum("nld,nsd->nls", qh, kh,
                   preferred_element_type=jnp.float32)          # [H*B, L, S]
    s = s - jnp.max(s, axis=-1, keepdims=True)
    p = jnp.exp(s)
    p = p * pl.reciprocal(jnp.sum(p, axis=-1, keepdims=True), approx=True)
    attn = jnp.einsum("nls,nsd->nld", p, vh,
                      preferred_element_type=jnp.float32)       # [H*B, L, d]

    # Merge heads back into the lane dim -> [B*L, E], then ONE dense out-projection.
    merged = jnp.transpose(attn.reshape(H, B * L, d), (0, 2, 1))  # [H, d, B*L]
    merged = merged.reshape(E, B * L).T                           # [B*L, E]
    out = jnp.dot(merged, wo_ref[...],
                  preferred_element_type=jnp.float32) + bo_ref[...]

    o_ref[...] = (id_ref[...] + out).astype(o_ref.dtype)


def init_params(rng, embed_dims):
    ks = jax.random.split(rng, 8)
    s = 0.05
    E = embed_dims
    return {
        # weights stored pre-transposed so a reference computes x @ W
        "wq": s * jax.random.normal(ks[0], (E, E), jnp.float32),
        "wk": s * jax.random.normal(ks[1], (E, E), jnp.float32),
        "wv": s * jax.random.normal(ks[2], (E, E), jnp.float32),
        "wo": s * jax.random.normal(ks[3], (E, E), jnp.float32),
        "bq": s * jax.random.normal(ks[4], (1, E), jnp.float32),
        "bk": s * jax.random.normal(ks[5], (1, E), jnp.float32),
        "bv": s * jax.random.normal(ks[6], (1, E), jnp.float32),
        "bo": s * jax.random.normal(ks[7], (1, E), jnp.float32),
    }


def multihead_flash_attention_forward(params, query, key=None, value=None,
                                      identity=None, query_pos=None, key_pos=None,
                                      *, num_heads):
    """Mirrors cosense3d MultiheadFlashAttention.forward (batch_first=True, eval)."""
    if key is None:
        key = query
    if value is None:
        value = key
    if identity is None:
        identity = query
    if key_pos is None and query_pos is not None and query_pos.shape == key.shape:
        key_pos = query_pos
    if query_pos is None:
        query_pos = jnp.zeros_like(query)
    if key_pos is None:
        key_pos = jnp.zeros_like(key)

    B, L, E = query.shape
    S = key.shape[1]
    H = num_heads
    d = E // H
    assert d * H == E

    # One-time wrapper-side parameter plumbing:
    #  * fold 1/sqrt(d) into Wq / bq,
    #  * stack the three in-projection weights / biases into single operands.
    scale = 1.0 / math.sqrt(d)
    w_in = jnp.stack([params["wq"] * scale, params["wk"], params["wv"]])   # [3, E, E]
    b_in = jnp.stack([params["bq"] * scale, params["bk"], params["bv"]])   # [3, 1, E]

    rows = lambda x: x.reshape(-1, E)
    q2, qp2, id2 = rows(query), rows(query_pos), rows(identity)
    k2, kp2, v2 = rows(key), rows(key_pos), rows(value)

    vmem = pl.BlockSpec(memory_space=pltpu.MemorySpace.VMEM)

    out_flat = pl.pallas_call(
        partial(_mha_kernel, num_heads=H, head_dim=d,
                batch=B, q_len=L, kv_len=S),
        out_shape=jax.ShapeDtypeStruct((B * L, E), query.dtype),
        in_specs=[vmem] * 10,
        out_specs=vmem,
    )(q2, qp2, k2, kp2, v2, id2, w_in, b_in, params["wo"], params["bo"])

    return out_flat.reshape(B, L, E)


def _reference(params, query, key, value, query_pos, key_pos, num_heads):
    B, L, E = query.shape
    hd = E // num_heads
    q = query + query_pos
    k = key + key_pos
    qp = q @ params["wq"] + params["bq"]
    kp = k @ params["wk"] + params["bk"]
    vp = value @ params["wv"] + params["bv"]
    split = lambda x: x.reshape(B, x.shape[1], num_heads, hd)
    qh, kh, vh = split(qp), split(kp), split(vp)
    s = jnp.einsum("blhd,bshd->bhls", qh, kh) / math.sqrt(hd)
    p = jax.nn.softmax(s, axis=-1)
    o = jnp.einsum("bhls,bshd->blhd", p, vh).reshape(B, L, E)
    o = o @ params["wo"] + params["bo"]
    return query + o   # identity = original query


if __name__ == "__main__":
    embed_dims, num_heads = 32, 4
    B, L, S = 2, 8, 16

    root = jax.random.PRNGKey(0)
    ks = jax.random.split(root, 6)
    query = jax.random.normal(ks[0], (B, L, embed_dims), jnp.float32)
    key = jax.random.normal(ks[1], (B, S, embed_dims), jnp.float32)
    value = jax.random.normal(ks[2], (B, S, embed_dims), jnp.float32)
    query_pos = 0.1 * jax.random.normal(ks[3], (B, L, embed_dims), jnp.float32)
    key_pos = 0.1 * jax.random.normal(ks[4], (B, S, embed_dims), jnp.float32)
    params = init_params(ks[5], embed_dims)

    fwd = jax.jit(partial(multihead_flash_attention_forward, num_heads=num_heads))
    out = fwd(params, query, key, value, query_pos=query_pos, key_pos=key_pos)
    jax.block_until_ready(out)

    ref = _reference(params, query, key, value, query_pos, key_pos, num_heads)
    assert out.shape == (B, L, embed_dims)
    # tolerance covers the EUP approximate reciprocal in the softmax and the
    # MXU's default (bf16-rounded) matmul precision; the original module runs
    # its attention under fp16 autocast, far coarser.
    assert jnp.allclose(out, ref, atol=2e-3, rtol=2e-3), "mismatch vs pure-JAX reference"

    print("KERNEL_OK")
</pallas_src>

<mosaic_0001>
module attributes {stable_mosaic.version = 11 : i64} {
  func.func @_mha_kernel(%arg0: memref<16x32xf32, #tpu.memory_space<vmem>>, %arg1: memref<16x32xf32, #tpu.memory_space<vmem>>, %arg2: memref<32x32xf32, #tpu.memory_space<vmem>>, %arg3: memref<32x32xf32, #tpu.memory_space<vmem>>, %arg4: memref<32x32xf32, #tpu.memory_space<vmem>>, %arg5: memref<16x32xf32, #tpu.memory_space<vmem>>, %arg6: memref<3x32x32xf32, #tpu.memory_space<vmem>>, %arg7: memref<3x1x32xf32, #tpu.memory_space<vmem>>, %arg8: memref<32x32xf32, #tpu.memory_space<vmem>>, %arg9: memref<1x32xf32, #tpu.memory_space<vmem>>, %arg10: memref<16x32xf32, #tpu.memory_space<vmem>>) attributes {dimension_semantics = [], scalar_prefetch = 0 : i64, scratch_operands = 0 : i64, tpu.core_type = #tpu.core_type<tc>} {
    %c0 = arith.constant 0 : index
    %c0_0 = arith.constant 0 : index
    %0 = vector.load %arg0[%c0, %c0_0] : memref<16x32xf32, #tpu.memory_space<vmem>>, vector<16x32xf32>
    %c0_1 = arith.constant 0 : index
    %c0_2 = arith.constant 0 : index
    %1 = vector.load %arg1[%c0_1, %c0_2] : memref<16x32xf32, #tpu.memory_space<vmem>>, vector<16x32xf32>
    %2 = arith.addf %0, %1 : vector<16x32xf32>
    %c0_3 = arith.constant 0 : index
    %c0_4 = arith.constant 0 : index
    %3 = vector.load %arg2[%c0_3, %c0_4] : memref<32x32xf32, #tpu.memory_space<vmem>>, vector<32x32xf32>
    %c0_5 = arith.constant 0 : index
    %c0_6 = arith.constant 0 : index
    %4 = vector.load %arg3[%c0_5, %c0_6] : memref<32x32xf32, #tpu.memory_space<vmem>>, vector<32x32xf32>
    %5 = arith.addf %3, %4 : vector<32x32xf32>
    %c0_7 = arith.constant 0 : index
    %c0_8 = arith.constant 0 : index
    %6 = vector.load %arg4[%c0_7, %c0_8] : memref<32x32xf32, #tpu.memory_space<vmem>>, vector<32x32xf32>
    %c0_9 = arith.constant 0 : index
    %c0_10 = arith.constant 0 : index
    %c0_11 = arith.constant 0 : index
    %7 = vector.load %arg6[%c0_9, %c0_10, %c0_11] : memref<3x32x32xf32, #tpu.memory_space<vmem>>, vector<1x32x32xf32>
    %8 = vector.shape_cast %7 : vector<1x32x32xf32> to vector<32x32xf32>
    %cst = arith.constant dense<0.000000e+00> : vector<16x32xf32>
    %9 = tpu.matmul %2, %8, %cst {dimension_numbers = #tpu.dot_dimension_numbers<[1], [0], [0], [1], [0, 0, 1, 1], [], []>} : vector<16x32xf32>, vector<32x32xf32>, vector<16x32xf32> -> vector<16x32xf32>
    %c0_12 = arith.constant 0 : index
    %c0_13 = arith.constant 0 : index
    %c0_14 = arith.constant 0 : index
    %10 = vector.load %arg7[%c0_12, %c0_13, %c0_14] : memref<3x1x32xf32, #tpu.memory_space<vmem>>, vector<1x1x32xf32>
    %11 = vector.shape_cast %10 : vector<1x1x32xf32> to vector<1x32xf32>
    %12 = vector.broadcast %11 : vector<1x32xf32> to vector<16x32xf32>
    %13 = arith.addf %9, %12 : vector<16x32xf32>
    %c1 = arith.constant 1 : index
    %c0_15 = arith.constant 0 : index
    %c0_16 = arith.constant 0 : index
    %14 = vector.load %arg6[%c1, %c0_15, %c0_16] : memref<3x32x32xf32, #tpu.memory_space<vmem>>, vector<1x32x32xf32>
    %15 = vector.shape_cast %14 : vector<1x32x32xf32> to vector<32x32xf32>
    %cst_17 = arith.constant dense<0.000000e+00> : vector<32x32xf32>
    %16 = tpu.matmul %5, %15, %cst_17 {dimension_numbers = #tpu.dot_dimension_numbers<[1], [0], [0], [1], [0, 0, 1, 1], [], []>} : vector<32x32xf32>, vector<32x32xf32>, vector<32x32xf32> -> vector<32x32xf32>
    %c1_18 = arith.constant 1 : index
    %c0_19 = arith.constant 0 : index
    %c0_20 = arith.constant 0 : index
    %17 = vector.load %arg7[%c1_18, %c0_19, %c0_20] : memref<3x1x32xf32, #tpu.memory_space<vmem>>, vector<1x1x32xf32>
    %18 = vector.shape_cast %17 : vector<1x1x32xf32> to vector<1x32xf32>
    %19 = vector.broadcast %18 : vector<1x32xf32> to vector<32x32xf32>
    %20 = arith.addf %16, %19 : vector<32x32xf32>
    %c2 = arith.constant 2 : index
    %c0_21 = arith.constant 0 : index
    %c0_22 = arith.constant 0 : index
    %21 = vector.load %arg6[%c2, %c0_21, %c0_22] : memref<3x32x32xf32, #tpu.memory_space<vmem>>, vector<1x32x32xf32>
    %22 = vector.shape_cast %21 : vector<1x32x32xf32> to vector<32x32xf32>
    %cst_23 = arith.constant dense<0.000000e+00> : vector<32x32xf32>
    %23 = tpu.matmul %6, %22, %cst_23 {dimension_numbers = #tpu.dot_dimension_numbers<[1], [0], [0], [1], [0, 0, 1, 1], [], []>} : vector<32x32xf32>, vector<32x32xf32>, vector<32x32xf32> -> vector<32x32xf32>
    %c2_24 = arith.constant 2 : index
    %c0_25 = arith.constant 0 : index
    %c0_26 = arith.constant 0 : index
    %24 = vector.load %arg7[%c2_24, %c0_25, %c0_26] : memref<3x1x32xf32, #tpu.memory_space<vmem>>, vector<1x1x32xf32>
    %25 = vector.shape_cast %24 : vector<1x1x32xf32> to vector<1x32xf32>
    %26 = vector.broadcast %25 : vector<1x32xf32> to vector<32x32xf32>
    %27 = arith.addf %23, %26 : vector<32x32xf32>
    %28 = tpu.transpose %13, [1, 0] : vector<16x32xf32> -> vector<32x16xf32>
    %29 = vector.shape_cast %28 : vector<32x16xf32> to vector<4x8x16xf32>
    %30 = tpu.transpose %29, [0, 2, 1] : vector<4x8x16xf32> -> vector<4x16x8xf32>
    %31 = vector.shape_cast %30 : vector<4x16x8xf32> to vector<8x8x8xf32>
    %32 = tpu.transpose %20, [1, 0] : vector<32x32xf32> -> vector<32x32xf32>
    %33 = vector.shape_cast %32 : vector<32x32xf32> to vector<4x8x32xf32>
    %34 = tpu.transpose %33, [0, 2, 1] : vector<4x8x32xf32> -> vector<4x32x8xf32>
    %35 = vector.shape_cast %34 : vector<4x32x8xf32> to vector<8x16x8xf32>
    %36 = tpu.transpose %27, [1, 0] : vector<32x32xf32> -> vector<32x32xf32>
    %37 = vector.shape_cast %36 : vector<32x32xf32> to vector<4x8x32xf32>
    %38 = tpu.transpose %37, [0, 2, 1] : vector<4x8x32xf32> -> vector<4x32x8xf32>
    %39 = vector.shape_cast %38 : vector<4x32x8xf32> to vector<8x16x8xf32>
    "tpu.trace_start"() <{level = 10 : i32, message = "nld,nsd->nls"}> : () -> ()
    %cst_27 = arith.constant dense<0.000000e+00> : vector<8x8x16xf32>
    %40 = tpu.matmul %31, %35, %cst_27 {dimension_numbers = #tpu.dot_dimension_numbers<[2], [2], [1], [1], [0, 0, 0, 1, 1, 1], [0], [0]>} : vector<8x8x8xf32>, vector<8x16x8xf32>, vector<8x8x16xf32> -> vector<8x8x16xf32>
    "tpu.trace_stop"() : () -> ()
    %cst_28 = arith.constant dense<0xFF800000> : vector<8x8xf32>
    %41 = vector.multi_reduction <maximumf>, %40, %cst_28 [2] : vector<8x8x16xf32> to vector<8x8xf32>
    %42 = vector.shape_cast %41 : vector<8x8xf32> to vector<8x8x1xf32>
    %43 = vector.broadcast %42 : vector<8x8x1xf32> to vector<8x8x16xf32>
    %44 = arith.subf %40, %43 : vector<8x8x16xf32>
    %45 = math.exp %44 : vector<8x8x16xf32>
    %cst_29 = arith.constant dense<0.000000e+00> : vector<8x8xf32>
    %46 = vector.multi_reduction <add>, %45, %cst_29 [2] : vector<8x8x16xf32> to vector<8x8xf32>
    %47 = vector.shape_cast %46 : vector<8x8xf32> to vector<8x8x1xf32>
    %48 = tpu.reciprocal %47 {approx = true} : vector<8x8x1xf32> -> vector<8x8x1xf32>
    %49 = vector.broadcast %48 : vector<8x8x1xf32> to vector<8x8x16xf32>
    %50 = arith.mulf %45, %49 : vector<8x8x16xf32>
    "tpu.trace_start"() <{level = 10 : i32, message = "nls,nsd->nld"}> : () -> ()
    %cst_30 = arith.constant dense<0.000000e+00> : vector<8x8x8xf32>
    %51 = tpu.matmul %50, %39, %cst_30 {dimension_numbers = #tpu.dot_dimension_numbers<[2], [1], [1], [2], [0, 0, 0, 1, 1, 2], [0], [0]>} : vector<8x8x16xf32>, vector<8x16x8xf32>, vector<8x8x8xf32> -> vector<8x8x8xf32>
    "tpu.trace_stop"() : () -> ()
    %52 = vector.shape_cast %51 : vector<8x8x8xf32> to vector<4x16x8xf32>
    %53 = tpu.transpose %52, [0, 2, 1] : vector<4x16x8xf32> -> vector<4x8x16xf32>
    %54 = vector.shape_cast %53 : vector<4x8x16xf32> to vector<32x16xf32>
    %55 = tpu.transpose %54, [1, 0] : vector<32x16xf32> -> vector<16x32xf32>
    %c0_31 = arith.constant 0 : index
    %c0_32 = arith.constant 0 : index
    %56 = vector.load %arg8[%c0_31, %c0_32] : memref<32x32xf32, #tpu.memory_space<vmem>>, vector<32x32xf32>
    %cst_33 = arith.constant dense<0.000000e+00> : vector<16x32xf32>
    %57 = tpu.matmul %55, %56, %cst_33 {dimension_numbers = #tpu.dot_dimension_numbers<[1], [0], [0], [1], [0, 0, 1, 1], [], []>} : vector<16x32xf32>, vector<32x32xf32>, vector<16x32xf32> -> vector<16x32xf32>
    %c0_34 = arith.constant 0 : index
    %c0_35 = arith.constant 0 : index
    %58 = vector.load %arg9[%c0_34, %c0_35] : memref<1x32xf32, #tpu.memory_space<vmem>>, vector<1x32xf32>
    %59 = vector.broadcast %58 : vector<1x32xf32> to vector<16x32xf32>
    %60 = arith.addf %57, %59 : vector<16x32xf32>
    %c0_36 = arith.constant 0 : index
    %c0_37 = arith.constant 0 : index
    %61 = vector.load %arg5[%c0_36, %c0_37] : memref<16x32xf32, #tpu.memory_space<vmem>>, vector<16x32xf32>
    %62 = arith.addf %61, %60 : vector<16x32xf32>
    %c0_38 = arith.constant 0 : index
    %c0_39 = arith.constant 0 : index
    %63 = vector.load %arg10[%c0_38, %c0_39] : memref<16x32xf32, #tpu.memory_space<vmem>>, vector<16x32xf32>
    tpu.vector_store %arg10[%c0_38, %c0_39], %62 {strides = array<i32>} : memref<16x32xf32, #tpu.memory_space<vmem>>, vector<16x32xf32>,
    return
  }
}

</mosaic_0001>

<bundles_post_ra>
// kernel: multihead_flash_attention_forward.1
= control target key start
LH: loop header
LB: loop body
LE: loop exit
PB: predicated region body
PF: predicated region fallthrough
CT: control target
= control target key end

     0   :  { %vm66_vm0 = vcmask 261120   ;;  %s1845_s0 = inlined_call_operand.vmem [shape: f32[16,32], index: 0, kind: input, shape index: {}, may-alias: {0,5}]   ;;  %s1846_s1 = inlined_call_operand.vmem [shape: f32[16,32], index: 1, kind: input, shape index: {}]   ;;  %s1847_s2 = inlined_call_operand.vmem [shape: f32[32,32], index: 2, kind: input, shape index: {}]   ;;  %s1848_s3 = inlined_call_operand.vmem [shape: f32[32,32], index: 3, kind: input, shape index: {}]   ;;  %s1849_s4 = inlined_call_operand.vmem [shape: f32[32,32], index: 4, kind: input, shape index: {}]   ;;  %s1850_s5 = inlined_call_operand.vmem [shape: f32[16,32], index: 5, kind: input, shape index: {}, may-alias: {0,5}]   ;;  %s1851_s6 = inlined_call_operand.vmem [shape: f32[3,32,32], index: 6, kind: input, shape index: {}]   ;;  %s1852_s7 = inlined_call_operand.vmem [shape: f32[3,1,32], index: 7, kind: input, shape index: {}]   ;;  %s1853_s8 = inlined_call_operand.vmem [shape: f32[32,32], index: 8, kind: input, shape index: {}]   ;;  %s1854_s9 = inlined_call_operand.vmem [shape: f32[1,32], index: 9, kind: input, shape index: {}]   ;;  %s1855_s10 = inlined_call_operand.hbm [shape: f32[16,32], index: 10, kind: output, shape index: {}]  }
   0x1   :  { %v61_v0 = vld [vmem:[%s1851_s6 + $0x18] sm:$0xff]  ;;  %v60_v2 = vld [vmem:[%s1851_s6 + $0x10] sm:$0xff]  ;;  %v59_v4 = vld [vmem:[%s1851_s6 + $0x8] sm:$0xff] }
   0x2   :  { %v1410_v1 = vld [vmem:[%s1851_s6 + $0x38] sm:$0xff]  ;;  %85 = vmatpush.msra.mxu0 %v61_v0  ;;  %v1409_v3 = vld [vmem:[%s1851_s6 + $0x30] sm:$0xff]  ;;  %v1408_v5 = vld [vmem:[%s1851_s6 + $0x28] sm:$0xff] }
   0x3   :  { %130 = vmatpush.msra.mxu1 %v1410_v1  ;;  %v36_v6 = vld [vmem:[%s1845_s0] sm:$0xff]  ;;  %v37_v14 = vld [vmem:[%s1845_s0 + $0x8] sm:$0xff] }
   0x4   :  { %86 = vmatpush.msra.mxu0 %v60_v2  ;;  %v38_v7 = vld [vmem:[%s1846_s1] sm:$0xff] }
   0x5   :  { %131 = vmatpush.msra.mxu1 %v1409_v3  ;;  %v42_v8 = vld [vmem:[%s1847_s2] sm:$0xff]  ;;  %v40_v12 = vadd.f32 %v38_v7, %v36_v6 }
   0x6   :  { %v46_v9 = vld [vmem:[%s1848_s3] sm:$0xff]  ;;  %87 = vmatpush.msra.mxu0 %v59_v4 }
   0x7   :  { %v58_v10 = vld [vmem:[%s1851_s6] sm:$0xff]  ;;  %v50_v13 = vadd.f32 %v46_v9, %v42_v8  ;;  %132 = vmatpush.msra.mxu1 %v1408_v5 }
   0x8   :  { %v1407_v11 = vld [vmem:[%s1851_s6 + $0x20] sm:$0xff]  ;;  %88 = vmatpush.msra.mxu0 %v58_v10 }
   0x9   :  { %133 = vmatpush.msra.mxu1 %v1407_v11  ;;  %1405 = vmatmul.msk.f32.vlgmr.msra.gmra.mxu0 %vm66_vm0, %v40_v12 }
   0xa   :  { %1412 = vmatmul.msk.f32.vlgmr.msra.gmra.mxu1 %vm66_vm0, %v50_v13 }
   0xb   :  { %15 = vsyncpa [#allocation3], 0  ;;  %v39_v15 = vld [vmem:[%s1846_s1 + $0x8] sm:$0xff]  ;;  %v44_v20 = vld [vmem:[%s1847_s2 + $0x10] sm:$0xff]  ;;  %vm678_vm1 = vcmask 64512   ;;  %vm911_vm2 = vcmask 130048  }
   0xc   :  { %v43_v16 = vld [vmem:[%s1847_s2 + $0x8] sm:$0xff]  ;;  %v41_v18 = vadd.f32 %v39_v15, %v37_v14  ;;  %v48_v21 = vld [vmem:[%s1848_s3 + $0x10] sm:$0xff]  ;;  %v45_v23 = vld [vmem:[%s1847_s2 + $0x18] sm:$0xff]  ;;  %s1573_s15 = smov [#allocation2]   ;;  %s1393_s19 = sshll.u32 %s1855_s10, 4  ;;  %s1394_s19 = int_to_ptr.hbm [resolvable:$true] %s1393_s19 }
   0xd   :  { %v47_v17 = vld [vmem:[%s1848_s3 + $0x8] sm:$0xff]  ;;  %v52_v22 = vadd.f32 %v48_v21, %v44_v20  ;;  %v49_v24 = vld [vmem:[%s1848_s3 + $0x18] sm:$0xff]  ;;  %v1511_v26 = vld [vmem:[%s1852_s7 + $0x1] ss:$0 sm:$0xff]  ;;  %s1391_s16 = sshll.u32 %s1573_s15, 4  ;;  %s1575_s22 = smov 8   ;;  %s1392_s16 = int_to_ptr.vmem [resolvable:$true] %s1391_s16 }
   0xe   :  { %v51_v19 = vadd.f32 %v47_v17, %v43_v16  ;;  %v53_v25 = vadd.f32 %v49_v24, %v45_v23  ;;  %v1512_v27 = vld [vmem:[%s1852_s7] ss:$0 sm:$0xff]  ;;  %v1419_v48 = vld [vmem:[%s1851_s6 + $0x58] sm:$0xff]  ;;  %v1418_v49 = vld [vmem:[%s1851_s6 + $0x50] sm:$0xff] }
   0xf   :  { %1459 = vmatpush.msra.mxu3 %v1419_v48  ;;  %181 = vmatpush.msra.mxu2 %v1419_v48  ;;  %v1417_v50 = vld [vmem:[%s1851_s6 + $0x48] sm:$0xff]  ;;  %v1416_v51 = vld [vmem:[%s1851_s6 + $0x40] sm:$0xff]  ;;  %v57_v52 = vld [vmem:[%s1849_s4 + $0x18] sm:$0xff] }
  0x10   :  { %v54_v14 = vld [vmem:[%s1849_s4] sm:$0xff]  ;;  %v56_v24 = vld [vmem:[%s1849_s4 + $0x10] sm:$0xff] }
  0x11   :  { %1406 = vmatmul.msk.f32.gmra.mxu0 %vm66_vm0, %v41_v18  ;;  %1460 = vmatpush.msra.mxu3 %v1418_v49 }
  0x12   :  { %1413 = vmatmul.msk.f32.gmra.mxu1 %vm66_vm0, %v51_v19  ;;  %182 = vmatpush.msra.mxu2 %v1418_v49  ;;  %v55_v19 = vld [vmem:[%s1849_s4 + $0x8] sm:$0xff] }
  0x13   :  { %1461 = vmatpush.msra.mxu3 %v1417_v50 }
  0x14   :  { %183 = vmatpush.msra.mxu2 %v1417_v50 }
  0x15   :  { %1462 = vmatpush.msra.mxu3 %v1416_v51 }
  0x16   :  { %184 = vmatpush.msra.mxu2 %v1416_v51  ;;  %1424 = vmatmul.msk.f32.vlgmr.msra.gmra.mxu3 %vm66_vm0, %v57_v52 }
  0x17   :  { %1421 = vmatmul.msk.f32.vlgmr.msra.gmra.mxu2 %vm66_vm0, %v54_v14 }
  0x1a   :  { %1414 = vmatmul.msk.f32.gmra.mxu1 %vm66_vm0, %v52_v22 }
  0x1f   :  { %1422 = vmatmul.msk.f32.gmra.mxu2 %vm66_vm0, %v55_v19 }
  0x22   :  { %1415 = vmatmul.msk.f32.gmra.mxu1 %vm66_vm0, %v53_v25 }
  0x27   :  { %1423 = vmatmul.msk.f32.gmra.mxu2 %vm66_vm0, %v56_v24 }
  0x86   :  { %v90_v28 = vpop.f32.mrf.mxu0 }
  0x87   :  { %v135_v29 = vpop.f32.mrf.mxu1  ;;  %v91_v31 = vadd.f32 %v1512_v27, %v90_v28 }
  0x88   :  { %v136_v30 = vadd.f32 %v1511_v26, %v135_v29 }
  0x89   :  { %198 = vxpose.xlu1.b32.start [1/2] (short) (narrow) %v91_v31, 32 }
  0x8a   :  { %358 = vxpose.xlu0.b32.start [1/4] (short) (narrow) %v136_v30, 32 }
  0x8e   :  { %v93_v32 = vpop.f32.mrf.mxu0 }
  0x8f   :  { %v138_v33 = vpop.f32.mrf.mxu1  ;;  %v94_v34 = vadd.f32 %v1512_v27, %v93_v32 }
  0x90   :  { %v139_v35 = vadd.f32 %v1511_v26, %v138_v33 }
  0x91   :  { %199 = vxpose.xlu1.b32.end [2/2] (short) (narrow) %v94_v34, 32 }
  0x92   :  { %359 = vxpose.xlu0.b32.cont [2/4] (short) (narrow) %v139_v35, 32 }
  0x97   :  { %v141_v36 = vpop.f32.mrf.mxu1 }
  0x98   :  { %v142_v37 = vadd.f32 %v1511_v26, %v141_v36 }
  0x99   :  { %v1743_v13 = vpop.f32.mrf.mxu3 }
  0x9a   :  { %360 = vxpose.xlu0.b32.cont [3/4] (short) (narrow) %v142_v37, 32 }
  0x9f   :  { %v144_v38 = vpop.f32.mrf.mxu1 }
  0xa0   :  { %v145_v39 = vadd.f32 %v1511_v26, %v144_v38 }
  0xa2   :  { %361 = vxpose.xlu0.b32.end [4/4] (short) (narrow) %v145_v39, 32 }
 0x12d   :  { %v214_v41 = vpop.trf.xlu1 }
 0x12e   :  { %v374_v40 = vpop.trf.xlu0  ;;  %230 = vxpose.xlu2.b32.start.end [1/1] (short) (narrow) %v214_v41, 16 }
 0x135   :  { %v215_v43 = vpop.trf.xlu1 }
 0x136   :  { %v375_v42 = vpop.trf.xlu0  ;;  %262 = vxpose.xlu0.b32.start.end [1/1] (short) (narrow) %v215_v43, 16 }
 0x137   :  { %422 = vxpose.xlu1.b32.start.end [1/1] (short) (narrow) %v375_v42, 32 }
 0x13d   :  { %v216_v45 = vpop.trf.xlu1 }
 0x13e   :  { %390 = vxpose.xlu2.b32.start.end [1/1] (short) (narrow) %v374_v40, 32  ;;  %v376_v44 = vpop.trf.xlu0 }
 0x145   :  { %v217_v47 = vpop.trf.xlu1 }
 0x146   :  { %454 = vxpose.xlu0.b32.start.end [1/1] (short) (narrow) %v376_v44, 32  ;;  %v377_v46 = vpop.trf.xlu0 }
 0x157   :  { %294 = vxpose.xlu1.b32.start.end [1/1] (short) (narrow) %v216_v45, 16 }
 0x15e   :  { %486 = vxpose.xlu2.b32.start.end [1/1] (short) (narrow) %v377_v46, 32 }
 0x17e   :  { %326 = vxpose.xlu2.b32.start.end [1/1] (short) (narrow) %v217_v47, 16 }
 0x1c7   :  { %v246_v53 = vpop.trf.xlu2 }
 0x1cf   :  { %v247_v54 = vpop.trf.xlu2 }
 0x1d7   :  { %v406_v55 = vpop.trf.xlu2 }
 0x1da   :  { %v278_v57 = vpop.trf.xlu0 }
 0x1db   :  { %v438_v56 = vpop.trf.xlu1 }
 0x1df   :  { %v407_v58 = vpop.trf.xlu2 }
 0x1e0   :  { %1425 = vmatpush.xpose.msk.msrb.mxu3 %vm678_vm1, %v407_v58 }
 0x1e2   :  { %v279_v60 = vpop.trf.xlu0 }
 0x1e3   :  { %v439_v59 = vpop.trf.xlu1 }
 0x1e4   :  { %1431 = vmatpush.xpose.msk.msrb.mxu0 %vm678_vm1, %v439_v59  ;;  %1426 = vmatpush.xpose.msk.msrb.mxu3 %vm678_vm1, %v406_v55 }
 0x1e7   :  { %1427 = vmatmul.msk.f32.vlgmr.msrb.gmra.mxu3 %vm678_vm1, %v246_v53  ;;  %v408_v61 = vpop.trf.xlu2 }
 0x1e8   :  { %1432 = vmatpush.xpose.msk.msrb.mxu0 %vm678_vm1, %v438_v56 }
 0x1ea   :  { %v470_v63 = vpop.trf.xlu0 }
 0x1eb   :  { %1433 = vmatmul.msk.f32.vlgmr.msrb.gmra.mxu0 %vm678_vm1, %v278_v57  ;;  %v440_v62 = vpop.trf.xlu1 }
 0x1ef   :  { %v409_v0 = vpop.trf.xlu2 }
 0x1f0   :  { %1428 = vmatpush.xpose.msk.msra.mxu3 %vm678_vm1, %v409_v0  ;;  %v1513_v0 = vld [vmem:[%s1852_s7 + $0x2] ss:$0 sm:$0xff] }
 0x1f2   :  { %v471_v2 = vpop.trf.xlu0 }
 0x1f3   :  { %v441_v1 = vpop.trf.xlu1  ;;  %1437 = vmatpush.xpose.msk.msra.mxu0 %vm678_vm1, %v471_v2 }
 0x1f4   :  { %1429 = vmatpush.xpose.msk.msra.mxu3 %vm678_vm1, %v408_v61 }
 0x1f7   :  { %1430 = vmatmul.msk.f32.vlgmr.msra.gmra.mxu3 %vm678_vm1, %v247_v54  ;;  %v502_v3 = vpop.trf.xlu2  ;;  %1438 = vmatpush.xpose.msk.msra.mxu0 %vm678_vm1, %v470_v63 }
 0x1f8   :  { %1434 = vmatpush.xpose.msk.msrb.mxu3 %vm678_vm1, %v441_v1 }
 0x1fa   :  { %v472_v5 = vpop.trf.xlu0 }
 0x1fb   :  { %v310_v4 = vpop.trf.xlu1 }
 0x1fc   :  { %1435 = vmatpush.xpose.msk.msrb.mxu3 %vm678_vm1, %v440_v62  ;;  %1439 = vmatmul.msk.f32.vlgmr.msra.gmra.mxu0 %vm678_vm1, %v310_v4 }
 0x1ff   :  { %v503_v6 = vpop.trf.xlu2  ;;  %1436 = vmatmul.msk.f32.vlgmr.msrb.gmra.mxu3 %vm678_vm1, %v279_v60  ;;  %v186_v60 = vpop.f32.mrf.mxu2 }
 0x200   :  { %1443 = vmatpush.xpose.msk.msrb.mxu0 %vm678_vm1, %v503_v6  ;;  %v187_v2 = vadd.f32 %v1513_v0, %v186_v60 }
 0x202   :  { %v473_v7 = vpop.trf.xlu0 }
 0x203   :  { %1440 = vmatpush.xpose.msk.msra.mxu3 %vm678_vm1, %v473_v7  ;;  %v311_v9 = vpop.trf.xlu1 }
 0x204   :  { %1444 = vmatpush.xpose.msk.msrb.mxu0 %vm678_vm1, %v502_v3 }
 0x207   :  { %v504_v8 = vpop.trf.xlu2  ;;  %1441 = vmatpush.xpose.msk.msra.mxu3 %vm678_vm1, %v472_v5  ;;  %v189_v5 = vpop.f32.mrf.mxu2 }
 0x20a   :  { %1442 = vmatmul.msk.f32.vlgmr.msra.gmra.mxu3 %vm678_vm1, %v311_v9 }
 0x20f   :  { %v505_v10 = vpop.trf.xlu2 }
 0x210   :  { %1446 = vmatpush.xpose.msk.msrb.mxu1 %vm678_vm1, %v505_v10  ;;  %v190_v10 = vadd.f32 %v1513_v0, %v189_v5 }
 0x214   :  { %1447 = vmatpush.xpose.msk.msrb.mxu1 %vm678_vm1, %v504_v8 }
 0x217   :  { %v342_v11 = vpop.trf.xlu2 }
 0x218   :  { %1445 = vmatmul.msk.f32.vlgmr.msrb.gmra.mxu0 %vm678_vm1, %v342_v11 }
 0x21f   :  { %v343_v12 = vpop.trf.xlu2 }
 0x220   :  { %1448 = vmatmul.msk.f32.vlgmr.msrb.gmra.mxu1 %vm678_vm1, %v343_v12 }
 0x268   :  { %v763_v15 = vpop.f32.mrf.mxu0 }
 0x269   :  { %v918_v16 = vsel %vm911_vm2, %v763_v15, -inf }
 0x26a   :  { %919 = vmax.xlane.f32.xlu1 %v918_v16  ;;  %v705_v17 = vpop.f32.mrf.mxu3 }
 0x26b   :  { %v912_v18 = vsel %vm911_vm2, %v705_v17, -inf }
 0x26c   :  { %913 = vmax.xlane.f32.xlu0 %v912_v18 }
 0x279   :  { %v821_v20 = vpop.f32.mrf.mxu0 }
 0x27a   :  { %v924_v21 = vsel %vm911_vm2, %v821_v20, -inf  ;;  %v734_v22 = vpop.f32.mrf.mxu3 }
 0x27b   :  { %925 = vmax.xlane.f32.xlu2 %v924_v21  ;;  %v915_v23 = vsel %vm911_vm2, %v734_v22, -inf }
 0x27c   :  { %916 = vmax.xlane.f32.xlu1 %v915_v23 }
 0x282   :  { %v792_v25 = vpop.f32.mrf.mxu3 }
 0x283   :  { %v921_v26 = vsel %vm911_vm2, %v792_v25, -inf }
 0x284   :  { %922 = vmax.xlane.f32.xlu1 %v921_v26 }
 0x28d   :  { %v850_v27 = vpop.f32.mrf.mxu3 }
 0x28e   :  { %v927_v28 = vsel %vm911_vm2, %v850_v27, -inf }
 0x28f   :  { %928 = vmax.xlane.f32.xlu1 %v927_v28 }
 0x295   :  { %v879_v29 = vpop.f32.mrf.mxu0 }
 0x296   :  { %v930_v30 = vsel %vm911_vm2, %v879_v29, -inf }
 0x297   :  { %931 = vmax.xlane.f32.xlu0 %v930_v30 }
 0x29d   :  { %v908_v31 = vpop.f32.mrf.mxu1 }
 0x29e   :  { %v933_v32 = vsel %vm911_vm2, %v908_v31, -inf }
 0x29f   :  { %934 = vmax.xlane.f32.xlu1 %v933_v32 }
 0x2dd   :  { %v920_v33 = vpop.xlane.xlu1 %919 }
 0x2de   :  { %v938_v34 = vsub.f32 %v763_v15, %v920_v33  ;;  %v192_v15 = vpop.f32.mrf.mxu2 }
 0x2df   :  { %v914_v36 = vpop.xlane.xlu0 %913  ;;  %v193_v16 = vadd.f32 %v1513_v0, %v192_v15 }
 0x2e0   :  { %v948_v35 = vmul.f32 1.442695, %v938_v34  ;;  %v936_v37 = vsub.f32 %v705_v17, %v914_v36  ;;  %v196_v17 = vadd.f32 %v1513_v0, %v1743_v13 }
 0x2e2   :  { %1515 = vpow2.f32 %v948_v35  ;;  %v944_v38 = vmul.f32 1.442695, %v936_v37 }
 0x2e4   :  { %1517 = vpow2.f32 %v944_v38 }
 0x2e8   :  { %v1765_v39 = vpop.eup %1515 }
 0x2e9   :  { %v966_v40 = vsel %vm911_vm2, %v1765_v39, 0.0 }
 0x2ea   :  { %967 = vadd.xlane.f32.xlu1 %v966_v40  ;;  %v1769_v41 = vpop.eup %1517 }
 0x2eb   :  { %v960_v42 = vsel %vm911_vm2, %v1769_v41, 0.0 }
 0x2ec   :  { %961 = vadd.xlane.f32.xlu0 %v960_v42 }
 0x2ee   :  { %v926_v43 = vpop.xlane.xlu2 %925 }
 0x2ef   :  { %v940_v44 = vsub.f32 %v821_v20, %v926_v43  ;;  %v917_v45 = vpop.xlane.xlu1 %916 }
 0x2f0   :  { %v937_v47 = vsub.f32 %v734_v22, %v917_v45 }
 0x2f1   :  { %v952_v46 = vmul.f32 1.442695, %v940_v44 }
 0x2f2   :  { %v946_v48 = vmul.f32 1.442695, %v937_v47 }
 0x2f3   :  { %1519 = vpow2.f32 %v952_v46 }
 0x2f4   :  { %1521 = vpow2.f32 %v946_v48 }
 0x2f7   :  { %v923_v49 = vpop.xlane.xlu1 %922 }
 0x2f8   :  { %v939_v51 = vsub.f32 %v792_v25, %v923_v49 }
 0x2f9   :  { %v1773_v50 = vpop.eup %1519 }
 0x2fa   :  { %v972_v52 = vsel %vm911_vm2, %v1773_v50, 0.0  ;;  %v1777_v53 = vpop.eup %1521  ;;  %v950_v54 = vmul.f32 1.442695, %v939_v51 }
 0x2fb   :  { %973 = vadd.xlane.f32.xlu2 %v972_v52  ;;  %v963_v55 = vsel %vm911_vm2, %v1777_v53, 0.0 }
 0x2fc   :  { %1523 = vpow2.f32 %v950_v54  ;;  %964 = vadd.xlane.f32.xlu1 %v963_v55 }
 0x302   :  { %v1781_v56 = vpop.eup %1523  ;;  %v929_v58 = vpop.xlane.xlu1 %928 }
 0x303   :  { %v969_v57 = vsel %vm911_vm2, %v1781_v56, 0.0  ;;  %v941_v62 = vsub.f32 %v850_v27, %v929_v58 }
 0x304   :  { %970 = vadd.xlane.f32.xlu1 %v969_v57 }
 0x305   :  { %v954_v1 = vmul.f32 1.442695, %v941_v62 }
 0x30a   :  { %v932_v59 = vpop.xlane.xlu0 %931 }
 0x30b   :  { %v942_v61 = vsub.f32 %v879_v29, %v932_v59 }
 0x30d   :  { %v956_v63 = vmul.f32 1.442695, %v942_v61 }
 0x30f   :  { %1525 = vpow2.f32 %v956_v63 }
 0x310   :  { %1527 = vpow2.f32 %v954_v1 }
 0x312   :  { %v935_v3 = vpop.xlane.xlu1 %934 }
 0x313   :  { %v943_v4 = vsub.f32 %v908_v31, %v935_v3 }
 0x315   :  { %v1788_v6 = vpop.eup %1525  ;;  %v958_v7 = vmul.f32 1.442695, %v943_v4  ;;  %518 = vxpose.xlu0.b32.start [1/4] (short) (narrow) %v187_v2, 32 }
 0x316   :  { %v978_v8 = vsel %vm911_vm2, %v1788_v6, 0.0  ;;  %v1792_v9 = vpop.eup %1527 }
 0x317   :  { %1529 = vpow2.f32 %v958_v7  ;;  %979 = vadd.xlane.f32.xlu2 %v978_v8  ;;  %v975_v11 = vsel %vm911_vm2, %v1792_v9, 0.0 }
 0x31d   :  { %v1796_v12 = vpop.eup %1529  ;;  %519 = vxpose.xlu0.b32.cont [2/4] (short) (narrow) %v190_v10, 32 }
 0x31e   :  { %v981_v14 = vsel %vm911_vm2, %v1796_v12, 0.0 }
 0x31f   :  { %976 = vadd.xlane.f32.xlu2 %v975_v11  ;;  %982 = vadd.xlane.f32.xlu1 %v981_v14 }
 0x325   :  { %520 = vxpose.xlu0.b32.cont [3/4] (short) (narrow) %v193_v16, 32 }
 0x32d   :  { %521 = vxpose.xlu0.b32.end [4/4] (short) (narrow) %v196_v17, 32  ;;  %v1346_v17 = vld [vmem:[%s1853_s8 + $0x10] sm:$0xff] }
 0x35d   :  { %v968_v27 = vpop.xlane.xlu1 %967 }
 0x35f   :  { %v962_v18 = vpop.xlane.xlu0 %961 }
 0x360   :  { %1531 = vrcp.f32 %v962_v18  ;;  %v1345_v18 = vld [vmem:[%s1853_s8 + $0x8] sm:$0xff] }
 0x366   :  { %v1532_v13 = vpop.eup %1531 }
 0x367   :  { %v992_v36 = vmul.f32 %v1532_v13, %v1769_v41 }
 0x36e   :  { %v974_v25 = vpop.xlane.xlu2 %973 }
 0x36f   :  { %v965_v29 = vpop.xlane.xlu1 %964  ;;  %1533 = vrcp.f32 %v974_v25 }
 0x370   :  { %1535 = vrcp.f32 %v965_v29 }
 0x371   :  { %1537 = vrcp.f32 %v968_v27 }
 0x375   :  { %v1534_v42 = vpop.eup %1533 }
 0x376   :  { %v996_v44 = vmul.f32 %v1534_v42, %v1773_v50  ;;  %v1536_v46 = vpop.eup %1535 }
 0x377   :  { %v971_v31 = vpop.xlane.xlu1 %970  ;;  %v1538_v49 = vpop.eup %1537  ;;  %v993_v51 = vmul.f32 %v1536_v46, %v1777_v53 }
 0x378   :  { %v994_v57 = vmul.f32 %v1538_v49, %v1765_v39 }
 0x38a   :  { %v980_v26 = vpop.xlane.xlu2 %979 }
 0x392   :  { %v977_v28 = vpop.xlane.xlu2 %976  ;;  %v983_v34 = vpop.xlane.xlu1 %982 }
 0x393   :  { %1539 = vrcp.f32 %v977_v28  ;;  %v1381_v28 = vld [vmem:[%s1850_s5] sm:$0xff] }
 0x394   :  { %1541 = vrcp.f32 %v980_v26  ;;  %v1514_v26 = vld [vmem:[%s1854_s9] ss:$0 sm:$0xff]  ;;  %s1574_s9 = smov 128  }
 0x395   :  { %1543 = vrcp.f32 %v971_v31 }
 0x396   :  { %1545 = vrcp.f32 %v983_v34 }
 0x399   :  { %v1540_v59 = vpop.eup %1539 }
 0x39a   :  { %v1542_v61 = vpop.eup %1541  ;;  %v997_v62 = vmul.f32 %v1540_v59, %v1792_v9 }
 0x39b   :  { %v998_v63 = vmul.f32 %v1542_v61, %v1788_v6  ;;  %v1544_v0 = vpop.eup %1543 }
 0x39c   :  { %v995_v4 = vmul.f32 %v1544_v0, %v1781_v56  ;;  %v1546_v7 = vpop.eup %1545 }
 0x39d   :  { %v999_v6 = vmul.f32 %v1546_v7, %v1796_v12  ;;  %v1347_v12 = vld [vmem:[%s1853_s8 + $0x18] sm:$0xff] }
 0x3b9   :  { %v534_v19 = vpop.trf.xlu0 }
 0x3c1   :  { %v535_v20 = vpop.trf.xlu0 }
 0x3c9   :  { %v536_v21 = vpop.trf.xlu0 }
 0x3ca   :  { %v1467_v22 = vpack.i.bf16 %v536_v21, %v534_v19  ;;  %v1344_v19 = vld [vmem:[%s1853_s8] sm:$0xff] }
 0x3cc   :  { %1468 = vxpose.xlu2.b32.start.end [1/1] (short) (narrow) %v1467_v22, 32 }
 0x3d1   :  { %v537_v23 = vpop.trf.xlu0 }
 0x3d2   :  { %v1489_v24 = vpack.i.bf16 %v537_v23, %v535_v20 }
 0x3d4   :  { %1490 = vxpose.xlu1.b32.start.end [1/1] (short) (narrow) %v1489_v24, 32 }
 0x465   :  { %v1469_v30 = vpop.trf.xlu2 }
 0x466   :  { %v1470_v35 = vunpack.i.l.bf16 %v1469_v30  ;;  %v1473_v38 = vunpack.i.h.bf16 %v1469_v30 }
 0x46d   :  { %v1474_v32 = vpop.trf.xlu2 }
 0x46e   :  { %v1475_v33 = vunpack.i.l.bf16 %v1474_v32  ;;  %v1478_v37 = vunpack.i.h.bf16 %v1474_v32  ;;  %v1382_v32 = vld [vmem:[%s1850_s5 + $0x8] sm:$0xff] }
 0x470   :  { %1017 = vmatpush.msrb.mxu2 %v1475_v33 }
 0x472   :  { %1018 = vmatpush.msrb.mxu2 %v1470_v35 }
 0x473   :  { %1449 = vmatmul.msk.f32.vlgmr.msrb.gmra.mxu2 %vm911_vm2, %v992_v36 }
 0x474   :  { %1109 = vmatpush.msra.mxu2 %v1478_v37 }
 0x475   :  { %v1479_v40 = vpop.trf.xlu2 }
 0x476   :  { %1110 = vmatpush.msra.mxu2 %v1473_v38  ;;  %v1480_v48 = vunpack.i.l.bf16 %v1479_v40  ;;  %v1483_v58 = vunpack.i.h.bf16 %v1479_v40 }
 0x478   :  { %v1491_v43 = vpop.trf.xlu1  ;;  %1370 = vmatpush.msrb.mxu2 %v1347_v12 }
 0x479   :  { %v1492_v50 = vunpack.i.l.bf16 %v1491_v43  ;;  %v1495_v53 = vunpack.i.h.bf16 %v1491_v43 }
 0x47a   :  { %1371 = vmatpush.msrb.mxu2 %v1346_v17 }
 0x47b   :  { %1453 = vmatmul.msk.f32.vlgmr.msra.gmra.mxu2 %vm911_vm2, %v996_v44 }
 0x47c   :  { %1372 = vmatpush.msrb.mxu2 %v1345_v18 }
 0x47d   :  { %v1484_v45 = vpop.trf.xlu2 }
 0x47e   :  { %v1485_v47 = vunpack.i.l.bf16 %v1484_v45  ;;  %v1488_v54 = vunpack.i.h.bf16 %v1484_v45  ;;  %1373 = vmatpush.msrb.mxu2 %v1344_v19 }
 0x480   :  { %1040 = vmatpush.msrb.mxu3 %v1485_v47  ;;  %v1496_v41 = vpop.trf.xlu1 }
 0x481   :  { %v1497_v52 = vunpack.i.l.bf16 %v1496_v41  ;;  %v1500_v55 = vunpack.i.h.bf16 %v1496_v41 }
 0x482   :  { %1041 = vmatpush.msrb.mxu3 %v1480_v48 }
 0x483   :  { %1450 = vmatmul.msk.f32.vlgmr.msrb.gmra.mxu3 %vm911_vm2, %v993_v51  ;;  %1063 = vmatpush.msra.mxu0 %v1497_v52 }
 0x484   :  { %1132 = vmatpush.msra.mxu3 %v1488_v54 }
 0x485   :  { %1064 = vmatpush.msra.mxu0 %v1492_v50 }
 0x486   :  { %1133 = vmatpush.msra.mxu3 %v1483_v58  ;;  %1451 = vmatmul.msk.f32.vlgmr.msra.gmra.mxu0 %vm911_vm2, %v994_v57 }
 0x487   :  { %1155 = vmatpush.msrb.mxu0 %v1500_v55 }
 0x488   :  { %v1501_v60 = vpop.trf.xlu1 }
 0x489   :  { %1156 = vmatpush.msrb.mxu0 %v1495_v53  ;;  %v1502_v3 = vunpack.i.l.bf16 %v1501_v60  ;;  %v1505_v5 = vunpack.i.h.bf16 %v1501_v60 }
 0x48b   :  { %1454 = vmatmul.msk.f32.vlgmr.msra.gmra.mxu3 %vm911_vm2, %v997_v62 }
 0x48e   :  { %1455 = vmatmul.msk.f32.vlgmr.msrb.gmra.mxu0 %vm911_vm2, %v998_v63 }
 0x490   :  { %v1506_v39 = vpop.trf.xlu1 }
 0x491   :  { %v1507_v1 = vunpack.i.l.bf16 %v1506_v39  ;;  %v1510_v2 = vunpack.i.h.bf16 %v1506_v39 }
 0x493   :  { %1086 = vmatpush.msra.mxu1 %v1507_v1 }
 0x495   :  { %1087 = vmatpush.msra.mxu1 %v1502_v3 }
 0x496   :  { %1452 = vmatmul.msk.f32.vlgmr.msra.gmra.mxu1 %vm911_vm2, %v995_v4 }
 0x497   :  { %1178 = vmatpush.msrb.mxu1 %v1510_v2 }
 0x499   :  { %1179 = vmatpush.msrb.mxu1 %v1505_v5 }
 0x49e   :  { %1456 = vmatmul.msk.f32.vlgmr.msrb.gmra.mxu1 %vm911_vm2, %v999_v6 }
 0x4f6   :  { %v1020_v8 = vpop.f32.mrf.mxu2 }
 0x4f7   :  { %1184 = vxpose.xlu0.b32.start [1/2] (short) (narrow) %v1020_v8, 8 }
 0x4fe   :  { %v1112_v56 = vpop.f32.mrf.mxu2 }
 0x503   :  { %v1066_v9 = vpop.f32.mrf.mxu0 }
 0x504   :  { %1216 = vxpose.xlu2.b32.start [1/2] (short) (narrow) %v1066_v9, 8 }
 0x506   :  { %v1043_v10 = vpop.f32.mrf.mxu3 }
 0x507   :  { %1185 = vxpose.xlu0.b32.end [2/2] (short) (narrow) %v1043_v10, 8 }
 0x50b   :  { %v1158_v11 = vpop.f32.mrf.mxu0 }
 0x50c   :  { %1280 = vxpose.xlu1.b32.start [1/2] (short) (narrow) %v1158_v11, 8 }
 0x50e   :  { %v1135_v15 = vpop.f32.mrf.mxu3 }
 0x50f   :  { %1248 = vxpose.xlu0.b32.start [1/2] (short) (narrow) %v1112_v56, 8 }
 0x513   :  { %v1089_v14 = vpop.f32.mrf.mxu1 }
 0x514   :  { %1217 = vxpose.xlu2.b32.end [2/2] (short) (narrow) %v1089_v14, 8 }
 0x517   :  { %1249 = vxpose.xlu0.b32.end [2/2] (short) (narrow) %v1135_v15, 8 }
 0x51b   :  { %v1181_v16 = vpop.f32.mrf.mxu1 }
 0x51c   :  { %1281 = vxpose.xlu1.b32.end [2/2] (short) (narrow) %v1181_v16, 8 }
 0x5a3   :  { %v1200_v20 = vpop.trf.xlu0 }
 0x5a4   :  { %1312 = vxpose.xlu0.b32.start [1/4] (short) (narrow) %v1200_v20, 16 }
 0x5a5   :  { %v1232_v21 = vpop.trf.xlu2 }
 0x5ac   :  { %1313 = vxpose.xlu0.b32.cont [2/4] (short) (narrow) %v1232_v21, 16 }
 0x5b3   :  { %v1264_v22 = vpop.trf.xlu0 }
 0x5b4   :  { %1314 = vxpose.xlu0.b32.cont [3/4] (short) (narrow) %v1264_v22, 16 }
 0x5b8   :  { %v1296_v23 = vpop.trf.xlu1 }
 0x5bc   :  { %1315 = vxpose.xlu0.b32.end [4/4] (short) (narrow) %v1296_v23, 16 }
 0x648   :  { %v1328_v24 = vpop.trf.xlu0 }
 0x649   :  { %1457 = vmatmul.msk.f32.vlgmr.msrb.gmra.mxu2 %vm66_vm0, %v1328_v24 }
 0x650   :  { %v1329_v25 = vpop.trf.xlu0 }
 0x651   :  { %1458 = vmatmul.msk.f32.gmra.mxu2 %vm66_vm0, %v1329_v25 }
 0x6cc   :  { %v1375_v27 = vpop.f32.mrf.mxu2 }
 0x6cd   :  { %v1376_v29 = vadd.f32 %v1514_v26, %v1375_v27 }
 0x6cf   :  { %v1383_v30 = vadd.f32 %v1381_v28, %v1376_v29 }
 0x6d1   :  { %1385 = vst.msk [vmem:[#allocation2] sm:$0xff] %vm66_vm0, %v1383_v30 }
 0x6d4   :  { %v1378_v31 = vpop.f32.mrf.mxu2 }
 0x6d5   :  { %v1379_v13 = vadd.f32 %v1514_v26, %v1378_v31 }
 0x6d7   :  { %v1384_v33 = vadd.f32 %v1382_v32, %v1379_v13 }
 0x6d9   :  { %1386 = vst.msk [vmem:[#allocation2 + $0x8] sm:$0xff] %vm66_vm0, %v1384_v33 }
 0x6da   :  { %1399 = dma.vmem_to_hbm [thread:$0]  %s1392_s16, 256, %s1394_s19, [#allocation3], %s1574_s9, %s1574_s9, %s1575_s22  }
 0x6db   :  { %1571 = dma.done.wait [#allocation3], 256  }
 0x6dc   :  { %1572 = vsyncadd [#allocation3], 4294967040 }
 0x6dd   :  { %1404 = vsyncpa [#allocation3], 1 }

</bundles_post_ra>
